<compile_context>
chip_gen: v7x
topology: tpu7x:2x2x1
jax: 0.10.0
libtpu: 0.0.40
codegen_flags: <defaults>
</compile_context>

<pallas_src>
import jax
import jax.numpy as jnp
from jax.experimental import pallas as pl
from jax.experimental.pallas import tpu as pltpu


GRAPH_EMB_DIM = 32
VOCAB_SIZE = 500
NUM_CLASSES = 3                                   # 'davidson' branch
BERT_OUT = NUM_CLASSES                            # x1 has one logit per class

K_IN = BERT_OUT + GRAPH_EMB_DIM + VOCAB_SIZE      # 535 = concat width
K_PAD = 640                                       # 535 + 1 bias col -> 5*128
N_PAD = 128                                       # lane-dense output width


def _round_up(x, m):
    return ((x + m - 1) // m) * m


def joint_linear_kernel(x_ref, w_ref, o_ref):
    """Single fused (TM, K_PAD) @ (K_PAD, N_PAD) MXU matmul.

    Bias is already baked into w_ref (row K_IN) against the ones-column of
    x_ref, so this is one dot + one lane-dense store, nothing else.
    """
    o_ref[...] = jnp.dot(
        x_ref[...], w_ref[...], preferred_element_type=jnp.float32
    ).astype(o_ref.dtype)


def prepare_params(weight, bias):
    """One-time packing of the frozen nn.Linear(535, 3) parameters.

    Returns a (K_PAD, N_PAD) float32 slab:
      rows 0:535, cols 0:3  = weight.T
      row  535,   cols 0:3  = bias        (multiplied by the ones-column of x)
      everything else       = 0           (padding -> contributes nothing)
    """
    assert weight.shape == (NUM_CLASSES, K_IN)
    assert bias.shape == (NUM_CLASSES,)
    w_packed = jnp.zeros((K_PAD, N_PAD), jnp.float32)
    w_packed = w_packed.at[:K_IN, :NUM_CLASSES].set(weight.T.astype(jnp.float32))
    w_packed = w_packed.at[K_IN, :NUM_CLASSES].set(bias.astype(jnp.float32))
    return w_packed


def joint_model_forward(x1, x2, x3, w_packed, *, block_b=512):
    """JointModel.forward tail: concat + simple_linear, as one Pallas matmul.

    Args:
      x1:       (B, 3)   BERT sub-model output
      x2:       (B, 32)  GraphSAGE sub-model output
      x3:       (B, 500) BOW sub-model output
      w_packed: (640, 128) output of prepare_params() (frozen, precomputed)
      block_b:  batch tile size for the grid (512 keeps tiles ~1.3 MB).
    Returns:
      (B, 3) logits, float32.
    """
    B = x1.shape[0]
    assert x1.shape[1] == BERT_OUT and x2.shape[1] == GRAPH_EMB_DIM
    assert x3.shape[1] == VOCAB_SIZE
    assert w_packed.shape == (K_PAD, N_PAD)

    # Pack activations to a single lane-aligned (B_pad, 640) slab:
    #   [x1 | x2 | x3 | 1 | zero-pad].  The ones-column picks up the bias row
    #   of w_packed; padded batch rows are all-zero and sliced off below.
    ones = jnp.ones((B, 1), jnp.float32)
    x_cat = jnp.concatenate(
        [x1.astype(jnp.float32), x2.astype(jnp.float32),
         x3.astype(jnp.float32), ones], axis=1)              # (B, 536)

    tm = min(block_b, _round_up(B, 8))
    b_pad = _round_up(B, tm)
    x_pad = jnp.pad(x_cat, ((0, b_pad - B), (0, K_PAD - x_cat.shape[1])))

    out_padded = pl.pallas_call(
        joint_linear_kernel,
        out_shape=jax.ShapeDtypeStruct((b_pad, N_PAD), jnp.float32),
        grid=(b_pad // tm,),
        in_specs=[
            pl.BlockSpec((tm, K_PAD), lambda i: (i, 0)),      # batch-tiled acts
            pl.BlockSpec((K_PAD, N_PAD), lambda i: (0, 0)),   # VMEM-resident W
        ],
        out_specs=pl.BlockSpec((tm, N_PAD), lambda i: (i, 0)),
        compiler_params=pltpu.CompilerParams(
            dimension_semantics=("parallel",)),               # v7x: 2 TCs
    )(x_pad, w_packed)

    return out_padded[:B, :NUM_CLASSES]


def init_params(key):
    """Deterministic init matching nn.Linear(535, 3) (uniform +-1/sqrt(fan_in))."""
    kw, kb = jax.random.split(key)
    bound = 1.0 / jnp.sqrt(jnp.float32(K_IN))
    weight = jax.random.uniform(kw, (NUM_CLASSES, K_IN), jnp.float32,
                                -bound, bound)
    bias = jax.random.uniform(kb, (NUM_CLASSES,), jnp.float32, -bound, bound)
    return weight, bias


if __name__ == "__main__":
    key = jax.random.PRNGKey(0)
    k_params, k1, k2, k3 = jax.random.split(key, 4)

    B = 4  # small batch of tweets

    # TODO(synk): BERT / GraphSAGE / TF-IDF sub-models are external pretrained
    # modules not defined in joint_model.py; their outputs are synthesized
    # deterministically here and fed to the fused classifier kernel.
    x1 = jax.random.normal(k1, (B, BERT_OUT), jnp.float32)        # BERT logits
    x2 = jax.random.normal(k2, (B, GRAPH_EMB_DIM), jnp.float32)   # graph emb
    x3 = jax.random.uniform(k3, (B, VOCAB_SIZE), jnp.float32)     # TF-IDF vec

    weight, bias = init_params(k_params)

    # One-time (frozen model) parameter packing — hoisted out of the hot path.
    w_packed = prepare_params(weight, bias)

    out = joint_model_forward(x1, x2, x3, w_packed)
    out = jax.block_until_ready(out)

    # Reference check against plain JAX (concat-then-linear).
    ref = jnp.concatenate([x1, x2, x3], axis=1) @ weight.T + bias
    assert out.shape == (B, NUM_CLASSES)
    assert jnp.allclose(out, ref, atol=1e-4, rtol=1e-4)

    print("KERNEL_OK")
</pallas_src>

<mosaic_0001>
module attributes {stable_mosaic.version = 11 : i64} {
  func.func @joint_linear_kernel(%arg0: i32, %arg1: memref<8x640xf32, #tpu.memory_space<vmem>>, %arg2: memref<640x128xf32, #tpu.memory_space<vmem>>, %arg3: memref<8x128xf32, #tpu.memory_space<vmem>>) attributes {dimension_semantics = [#tpu.dimension_semantics<parallel>], iteration_bounds = array<i64: 1>, scalar_prefetch = 0 : i64, scratch_operands = 0 : i64, tpu.core_type = #tpu.core_type<tc>, window_params = [{transform_indices = @transform_0, window_bounds = array<i64: 8, 640>}, {pipeline_mode = #tpu.pipeline_mode<synchronous>, transform_indices = @transform_1, window_bounds = array<i64: 640, 128>}, {transform_indices = @transform_2, window_bounds = array<i64: 8, 128>}]} {
    %c0 = arith.constant 0 : index
    %c0_0 = arith.constant 0 : index
    %0 = vector.load %arg1[%c0, %c0_0] : memref<8x640xf32, #tpu.memory_space<vmem>>, vector<8x640xf32>
    %c0_1 = arith.constant 0 : index
    %c0_2 = arith.constant 0 : index
    %1 = vector.load %arg2[%c0_1, %c0_2] : memref<640x128xf32, #tpu.memory_space<vmem>>, vector<640x128xf32>
    %cst = arith.constant dense<0.000000e+00> : vector<8x128xf32>
    %2 = tpu.matmul %0, %1, %cst {dimension_numbers = #tpu.dot_dimension_numbers<[1], [0], [0], [1], [0, 0, 1, 1], [], []>} : vector<8x640xf32>, vector<640x128xf32>, vector<8x128xf32> -> vector<8x128xf32>
    %c0_3 = arith.constant 0 : index
    %c0_4 = arith.constant 0 : index
    %3 = vector.load %arg3[%c0_3, %c0_4] : memref<8x128xf32, #tpu.memory_space<vmem>>, vector<8x128xf32>
    tpu.vector_store %arg3[%c0_3, %c0_4], %2 {strides = array<i32>} : memref<8x128xf32, #tpu.memory_space<vmem>>, vector<8x128xf32>,
    return
  }
  func.func @transform_0(%arg0: i32) -> (i32, i32) {
    %c0_i32 = arith.constant 0 : i32
    %c0_i32_0 = arith.constant 0 : i32
    return %arg0, %c0_i32 : i32, i32
  }
  func.func @transform_1(%arg0: i32) -> (i32, i32) {
    %c0_i32 = arith.constant 0 : i32
    %c0_i32_0 = arith.constant 0 : i32
    %c0_i32_1 = arith.constant 0 : i32
    return %c0_i32, %c0_i32_0 : i32, i32
  }
  func.func @transform_2(%arg0: i32) -> (i32, i32) {
    %c0_i32 = arith.constant 0 : i32
    %c0_i32_0 = arith.constant 0 : i32
    return %arg0, %c0_i32 : i32, i32
  }
}

</mosaic_0001>

<bundles_post_ra>
// kernel: tpu_custom_call.1
= control target key start
LH: loop header
LB: loop body
LE: loop exit
PB: predicated region body
PF: predicated region fallthrough
CT: control target
= control target key end

     0   :  { %7 = vsyncpa [#allocation3], 0  ;;  %s706_s0 = inlined_call_operand.hbm [shape: f32[8,640], index: 0, kind: input, shape index: {}]   ;;  %s707_s1 = inlined_call_operand.hbm [shape: f32[640,128], index: 1, kind: input, shape index: {}]   ;;  %s708_s2 = inlined_call_operand.hbm [shape: f32[8,128], index: 2, kind: output, shape index: {}]  }
   0x1   :  { %8 = vsyncpa [#allocation6], 0 }
   0x2   :  { %9 = vsyncpa [#allocation4], 0  ;;  %s640_s9 = smov [#allocation2]   ;;  %s641_s11 = smov [#allocation5]  }
   0x3   :  { %s16_s10 = sshll.u32 %s640_s9, 4  ;;  %s25_s12 = sshll.u32 %s641_s11, 4  ;;  %s17_s10 = int_to_ptr.vmem [resolvable:$true] %s16_s10  ;;  %s663_s12 = int_to_ptr.vmem [resolvable:$true] %s25_s12 }
   0x4   :  { %s568_s15 = scalar_lea.hbm %s706_s0, 640 }
   0x5   :  { %p569_p0 = scmp.ne.s32.totalorder %s706_s0, %s568_s15  ;;  %p572_p1 = scmp.lt.u32.totalorder %s568_s15, %s706_s0 }
   0x7   :  { %p574_p2 = pnand %p572_p1, %p569_p0 }
   0x9   :  { %577 = shalt.err (!%p574_p2)
}
   0xa   :  { %s578_s20 = scalar_lea.vmem %s17_s10, 640  ;;  %p583_p4 = scmp.lt.s32.totalorder %s17_s10, %s17_s10 }
   0xb   :  { %p579_p3 = scmp.ne.s32.totalorder %s17_s10, %s578_s20  ;;  %p584_p5 = scmp.lt.s32.totalorder %s578_s20, %s578_s20 }
   0xd   :  { %p585_p6 = por %p584_p5, %p583_p4 }
   0xf   :  { %p586_p7 = pnand %p585_p6, %p579_p3 }
  0x11   :  { %589 = shalt.err (!%p586_p7)
}
  0x12   :  { %19 = dma.hbm_to_vmem [thread:$0]  %s706_s0, 640, %s17_s10, [#allocation3]  }
  0x13   :  { %s590_s25 = scalar_lea.hbm %s707_s1, 10240 }
  0x14   :  { %p591_p8 = scmp.ne.s32.totalorder %s707_s1, %s590_s25  ;;  %p594_p9 = scmp.lt.u32.totalorder %s590_s25, %s707_s1 }
  0x16   :  { %p596_p10 = pnand %p594_p9, %p591_p8 }
  0x18   :  { %599 = shalt.err (!%p596_p10)
}
  0x19   :  { %s600_s30 = scalar_lea.vmem %s663_s12, 10240  ;;  %p605_p12 = scmp.lt.s32.totalorder %s663_s12, %s663_s12 }
  0x1a   :  { %p601_p11 = scmp.ne.s32.totalorder %s663_s12, %s600_s30  ;;  %p606_p13 = scmp.lt.s32.totalorder %s600_s30, %s600_s30 }
  0x1c   :  { %p607_p0 = por %p606_p13, %p605_p12 }
  0x1e   :  { %p608_p1 = pnand %p607_p0, %p601_p11 }
  0x20   :  { %611 = shalt.err (!%p608_p1)
}
  0x21   :  { %s642_s0 = smov 128   ;;  %s643_s3 = smov 8  }
  0x22   :  { %31 = dma.hbm_to_vmem [thread:$0]  %s707_s1, 10240, %s663_s12, [#allocation6], %s642_s0, %s642_s0, %s643_s3  }
  0x23   :  { %634 = dma.done.wait [#allocation3], 640  }
  0x24   :  { %635 = vsyncadd [#allocation3], 4294966656 }
  0x25   :  { %636 = dma.done.wait [#allocation6], 10240  }
  0x26   :  { %637 = vsyncadd [#allocation6], 4294957056  ;;  %v59_v0 = vld [vmem:[#allocation5 + $0x80] sm:$0xff]  ;;  %v60_v1 = vld [vmem:[#allocation5 + $0x88] sm:$0xff]  ;;  %vm645_vm0 = vmmov 0   ;;  %s647_s1 = smov [#allocation7]  }
  0x27   :  { %v91_v2 = vld [vmem:[#allocation5 + $0x180] sm:$0xff]  ;;  %v472_v3 = vpack.c.bf16 %v60_v1, %v59_v0  ;;  %v92_v4 = vld [vmem:[#allocation5 + $0x188] sm:$0xff]  ;;  %v61_v11 = vld [vmem:[#allocation5 + $0x90] sm:$0xff]  ;;  %s340_s6 = sshll.u32 %s647_s1, 4  ;;  %s341_s6 = int_to_ptr.vmem [resolvable:$true] %s340_s6 }
  0x28   :  { %v43_v5 = vld [vmem:[#allocation5] sm:$0xff]  ;;  %v44_v6 = vld [vmem:[#allocation5 + $0x8] sm:$0xff]  ;;  %v504_v7 = vpack.c.bf16 %v92_v4, %v91_v2  ;;  %v62_v13 = vld [vmem:[#allocation5 + $0x98] sm:$0xff]  ;;  %s612_s7 = scalar_lea.vmem %s341_s6, 128  ;;  %p617_p3 = scmp.lt.s32.totalorder %s341_s6, %s341_s6 }
  0x29   :  { %v474_v8 = vpack.c.bf16 %v44_v6, %v43_v5  ;;  %v75_v9 = vld [vmem:[#allocation5 + $0x100] sm:$0xff]  ;;  %v76_v10 = vld [vmem:[#allocation5 + $0x108] sm:$0xff]  ;;  %473 = vmatprep.subr.bf16.mxu0 %v472_v3  ;;  %v93_v14 = vld [vmem:[#allocation5 + $0x190] sm:$0xff]  ;;  %v476_v16 = vpack.c.bf16 %v62_v13, %v61_v11  ;;  %p613_p2 = scmp.ne.s32.totalorder %s341_s6, %s612_s7  ;;  %p618_p4 = scmp.lt.s32.totalorder %s612_s7, %s612_s7 }
  0x2a   :  { %v506_v12 = vpack.c.bf16 %v76_v10, %v75_v9  ;;  %v94_v15 = vld [vmem:[#allocation5 + $0x198] sm:$0xff]  ;;  %505 = vmatprep.subr.bf16.mxu1 %v504_v7  ;;  %v45_v18 = vld [vmem:[#allocation5 + $0x10] sm:$0xff]  ;;  %v63_v23 = vld [vmem:[#allocation5 + $0xa0] sm:$0xff] }
  0x2b   :  { %475 = vmatpush3.bf16.msra.mxu0 %v474_v8  ;;  %v508_v17 = vpack.c.bf16 %v94_v15, %v93_v14  ;;  %v46_v19 = vld [vmem:[#allocation5 + $0x18] sm:$0xff]  ;;  %v77_v20 = vld [vmem:[#allocation5 + $0x110] sm:$0xff]  ;;  %v64_v24 = vld [vmem:[#allocation5 + $0xa8] sm:$0xff]  ;;  %p619_p5 = por %p618_p4, %p617_p3 }
  0x2c   :  { %507 = vmatpush3.bf16.msra.mxu1 %v506_v12  ;;  %v478_v21 = vpack.c.bf16 %v46_v19, %v45_v18  ;;  %v78_v22 = vld [vmem:[#allocation5 + $0x118] sm:$0xff]  ;;  %477 = vmatprep.subr.bf16.mxu0 %v476_v16  ;;  %v480_v26 = vpack.c.bf16 %v64_v24, %v63_v23  ;;  %v95_v27 = vld [vmem:[#allocation5 + $0x1a0] sm:$0xff]  ;;  %v96_v28 = vld [vmem:[#allocation5 + $0x1a8] sm:$0xff] }
  0x2d   :  { %509 = vmatprep.subr.bf16.mxu1 %v508_v17  ;;  %v510_v25 = vpack.c.bf16 %v78_v22, %v77_v20  ;;  %v47_v29 = vld [vmem:[#allocation5 + $0x20] sm:$0xff]  ;;  %v512_v30 = vpack.c.bf16 %v96_v28, %v95_v27  ;;  %v48_v31 = vld [vmem:[#allocation5 + $0x28] sm:$0xff]  ;;  %v65_v35 = vld [vmem:[#allocation5 + $0xb0] sm:$0xff]  ;;  %p620_p6 = pnand %p619_p5, %p613_p2 }
  0x2e   :  { %v79_v32 = vld [vmem:[#allocation5 + $0x120] sm:$0xff]  ;;  %v80_v33 = vld [vmem:[#allocation5 + $0x128] sm:$0xff]  ;;  %v482_v34 = vpack.c.bf16 %v48_v31, %v47_v29  ;;  %v66_v36 = vld [vmem:[#allocation5 + $0xb8] sm:$0xff] }
  0x2f   :  { %479 = vmatpush3.bf16.msra.mxu0 %v478_v21  ;;  %v97_v37 = vld [vmem:[#allocation5 + $0x1b0] sm:$0xff]  ;;  %v514_v38 = vpack.c.bf16 %v80_v33, %v79_v32  ;;  %v484_v39 = vpack.c.bf16 %v66_v36, %v65_v35  ;;  %v98_v40 = vld [vmem:[#allocation5 + $0x1b8] sm:$0xff]  ;;  %v67_v46 = vld [vmem:[#allocation5 + $0xc0] sm:$0xff] }
  0x30   :  { %511 = vmatpush3.bf16.msra.mxu1 %v510_v25  ;;  %481 = vmatprep.subr.bf16.mxu0 %v480_v26  ;;  %v49_v41 = vld [vmem:[#allocation5 + $0x30] sm:$0xff]  ;;  %v50_v42 = vld [vmem:[#allocation5 + $0x38] sm:$0xff]  ;;  %v516_v43 = vpack.c.bf16 %v98_v40, %v97_v37  ;;  %v68_v47 = vld [vmem:[#allocation5 + $0xc8] sm:$0xff] }
  0x31   :  { %513 = vmatprep.subr.bf16.mxu1 %v512_v30  ;;  %v81_v44 = vld [vmem:[#allocation5 + $0x130] sm:$0xff]  ;;  %v82_v45 = vld [vmem:[#allocation5 + $0x138] sm:$0xff]  ;;  %v99_v48 = vld [vmem:[#allocation5 + $0x1c0] sm:$0xff]  ;;  %v486_v50 = vpack.c.bf16 %v50_v42, %v49_v41  ;;  %v488_v52 = vpack.c.bf16 %v68_v47, %v67_v46 }
  0x32   :  { %v100_v49 = vld [vmem:[#allocation5 + $0x1c8] sm:$0xff]  ;;  %v518_v51 = vpack.c.bf16 %v82_v45, %v81_v44  ;;  %v51_v53 = vld [vmem:[#allocation5 + $0x40] sm:$0xff]  ;;  %v69_v58 = vld [vmem:[#allocation5 + $0xd0] sm:$0xff]  ;;  %v646_v45 = vmov 0.0  }
  0x33   :  { %483 = vmatpush3.bf16.msra.mxu0 %v482_v34  ;;  %v52_v54 = vld [vmem:[#allocation5 + $0x48] sm:$0xff]  ;;  %v83_v55 = vld [vmem:[#allocation5 + $0x140] sm:$0xff]  ;;  %v520_v56 = vpack.c.bf16 %v100_v49, %v99_v48  ;;  %v70_v59 = vld [vmem:[#allocation5 + $0xd8] sm:$0xff] }
  0x34   :  { %515 = vmatpush3.bf16.msra.mxu1 %v514_v38  ;;  %485 = vmatprep.subr.bf16.mxu0 %v484_v39  ;;  %v84_v57 = vld [vmem:[#allocation5 + $0x148] sm:$0xff]  ;;  %v101_v60 = vld [vmem:[#allocation5 + $0x1d0] sm:$0xff]  ;;  %v102_v61 = vld [vmem:[#allocation5 + $0x1d8] sm:$0xff]  ;;  %v490_v62 = vpack.c.bf16 %v52_v54, %v51_v53  ;;  %v492_v0 = vpack.c.bf16 %v70_v59, %v69_v58  ;;  %v644_v39 = vmov 0.0|0.0  }
  0x35   :  { %517 = vmatprep.subr.bf16.mxu1 %v516_v43  ;;  %v522_v63 = vpack.c.bf16 %v84_v57, %v83_v55  ;;  %v53_v1 = vld [vmem:[#allocation5 + $0x50] sm:$0xff]  ;;  %v54_v2 = vld [vmem:[#allocation5 + $0x58] sm:$0xff]  ;;  %v524_v4 = vpack.c.bf16 %v102_v61, %v101_v60  ;;  %v71_v6 = vld [vmem:[#allocation5 + $0xe0] sm:$0xff] }
  0x36   :  { %v85_v3 = vld [vmem:[#allocation5 + $0x150] sm:$0xff]  ;;  %v86_v5 = vld [vmem:[#allocation5 + $0x158] sm:$0xff]  ;;  %v72_v7 = vld [vmem:[#allocation5 + $0xe8] sm:$0xff]  ;;  %v494_v10 = vpack.c.bf16 %v54_v2, %v53_v1 }
  0x37   :  { %487 = vmatpush3.bf16.msra.mxu0 %v486_v50  ;;  %v103_v8 = vld [vmem:[#allocation5 + $0x1e0] sm:$0xff]  ;;  %v104_v9 = vld [vmem:[#allocation5 + $0x1e8] sm:$0xff]  ;;  %v526_v13 = vpack.c.bf16 %v86_v5, %v85_v3  ;;  %v496_v14 = vpack.c.bf16 %v72_v7, %v71_v6  ;;  %v41_v17 = vld [vmem:[#allocation2 + $0x18] sm:$0xff] }
  0x38   :  { %519 = vmatpush3.bf16.msra.mxu1 %v518_v51  ;;  %489 = vmatprep.subr.bf16.mxu0 %v488_v52  ;;  %v55_v11 = vld [vmem:[#allocation5 + $0x60] sm:$0xff]  ;;  %v56_v12 = vld [vmem:[#allocation5 + $0x68] sm:$0xff]  ;;  %v528_v18 = vpack.c.bf16 %v104_v9, %v103_v8  ;;  %v73_v20 = vld [vmem:[#allocation5 + $0xf0] sm:$0xff] }
  0x39   :  { %521 = vmatprep.subr.bf16.mxu1 %v520_v56  ;;  %v87_v15 = vld [vmem:[#allocation5 + $0x160] sm:$0xff]  ;;  %v88_v19 = vld [vmem:[#allocation5 + $0x168] sm:$0xff]  ;;  %v74_v21 = vld [vmem:[#allocation5 + $0xf8] sm:$0xff]  ;;  %257 = vmatprep.mubr.f32.mxu1 %v41_v17  ;;  %v498_v24 = vpack.c.bf16 %v56_v12, %v55_v11 }
  0x3a   :  { %v39_v16 = vld [vmem:[#allocation2 + $0x8] sm:$0xff]  ;;  %v105_v22 = vld [vmem:[#allocation5 + $0x1f0] sm:$0xff]  ;;  %v106_v23 = vld [vmem:[#allocation5 + $0x1f8] sm:$0xff]  ;;  %v530_v25 = vpack.c.bf16 %v88_v19, %v87_v15  ;;  %v500_v26 = vpack.c.bf16 %v74_v21, %v73_v20 }
  0x3b   :  { %491 = vmatpush3.bf16.msra.mxu0 %v490_v62  ;;  %187 = vmatprep.mubr.f32.mxu0 %v39_v16  ;;  %v57_v27 = vld [vmem:[#allocation5 + $0x70] sm:$0xff]  ;;  %v58_v28 = vld [vmem:[#allocation5 + $0x78] sm:$0xff]  ;;  %v532_v29 = vpack.c.bf16 %v106_v23, %v105_v22  ;;  %v107_v34 = vld [vmem:[#allocation5 + $0x200] sm:$0xff] }
  0x3c   :  { %523 = vmatpush3.bf16.msra.mxu1 %v522_v63  ;;  %493 = vmatprep.subr.bf16.mxu0 %v492_v0  ;;  %v89_v30 = vld [vmem:[#allocation5 + $0x170] sm:$0xff]  ;;  %v90_v31 = vld [vmem:[#allocation5 + $0x178] sm:$0xff]  ;;  %v502_v32 = vpack.c.bf16 %v58_v28, %v57_v27  ;;  %v108_v35 = vld [vmem:[#allocation5 + $0x208] sm:$0xff] }
  0x3d   :  { %525 = vmatprep.subr.bf16.mxu1 %v524_v4  ;;  %v534_v33 = vpack.c.bf16 %v90_v31, %v89_v30  ;;  %v38_v36 = vld [vmem:[#allocation2] sm:$0xff]  ;;  %v537_v37 = vpack.c.bf16 %v108_v35, %v107_v34  ;;  %v40_v38 = vld [vmem:[#allocation2 + $0x10] sm:$0xff]  ;;  %v109_v40 = vld [vmem:[#allocation5 + $0x210] sm:$0xff] }
  0x3e   :  { %v110_v41 = vld [vmem:[#allocation5 + $0x218] sm:$0xff]  ;;  %v111_v43 = vld [vmem:[#allocation5 + $0x220] sm:$0xff]  ;;  %v112_v44 = vld [vmem:[#allocation5 + $0x228] sm:$0xff] }
  0x3f   :  { %495 = vmatpush3.bf16.msra.mxu0 %v494_v10  ;;  %v540_v42 = vpack.c.bf16 %v110_v41, %v109_v40  ;;  %v543_v46 = vpack.c.bf16 %v112_v44, %v111_v43  ;;  %v113_v47 = vld [vmem:[#allocation5 + $0x230] sm:$0xff]  ;;  %v114_v48 = vld [vmem:[#allocation5 + $0x238] sm:$0xff]  ;;  %v115_v50 = vld [vmem:[#allocation5 + $0x240] sm:$0xff] }
  0x40   :  { %527 = vmatpush3.bf16.msra.mxu1 %v526_v13  ;;  %497 = vmatprep.subr.bf16.mxu0 %v496_v14  ;;  %v546_v49 = vpack.c.bf16 %v114_v48, %v113_v47  ;;  %v116_v51 = vld [vmem:[#allocation5 + $0x248] sm:$0xff]  ;;  %v117_v53 = vld [vmem:[#allocation5 + $0x250] sm:$0xff]  ;;  %v118_v54 = vld [vmem:[#allocation5 + $0x258] sm:$0xff] }
  0x41   :  { %529 = vmatprep.subr.bf16.mxu1 %v528_v18  ;;  %v549_v52 = vpack.c.bf16 %v116_v51, %v115_v50  ;;  %v552_v55 = vpack.c.bf16 %v118_v54, %v117_v53  ;;  %v119_v56 = vld [vmem:[#allocation5 + $0x260] sm:$0xff]  ;;  %v120_v57 = vld [vmem:[#allocation5 + $0x268] sm:$0xff]  ;;  %v121_v59 = vld [vmem:[#allocation5 + $0x270] sm:$0xff] }
  0x42   :  { %v555_v58 = vpack.c.bf16 %v120_v57, %v119_v56  ;;  %v122_v60 = vld [vmem:[#allocation5 + $0x278] sm:$0xff] }
  0x43   :  { %499 = vmatpush3.bf16.msra.mxu0 %v498_v24  ;;  %v558_v61 = vpack.c.bf16 %v122_v60, %v121_v59  ;;  %v42_v62 = vld [vmem:[#allocation2 + $0x20] sm:$0xff] }
  0x44   :  { %531 = vmatpush3.bf16.msra.mxu1 %v530_v25  ;;  %501 = vmatprep.subr.bf16.mxu0 %v500_v26 }
  0x45   :  { %533 = vmatprep.subr.bf16.mxu1 %v532_v29 }
  0x47   :  { %503 = vmatpush3.bf16.msra.mxu0 %v502_v32 }
  0x48   :  { %535 = vmatpush3.bf16.msra.mxu1 %v534_v33  ;;  %536 = vmatprep.subr.bf16.mxu0 %v644_v39 }
  0x4a   :  { %188 = vmatmul.mubr.f32.vlgmr.msra.gmra.mrb[0].mxu0 %v38_v36 }
  0x4b   :  { %258 = vmatmul.mubr.f32.vlgmr.msra.gmra.mrb[0].mxu1 %v40_v38  ;;  %538 = vmatpush3.bf16.msra.mxu0 %v537_v37 }
  0x4c   :  { %539 = vmatprep.subr.bf16.mxu0 %v644_v39  ;;  %469 = vmatprep.mubr.msk.f32.mxu0 %vm645_vm0, %v646_v45 }
  0x4f   :  { %541 = vmatpush3.bf16.msra.mxu0 %v540_v42 }
  0x50   :  { %542 = vmatprep.subr.bf16.mxu0 %v644_v39 }
  0x53   :  { %544 = vmatpush3.bf16.msra.mxu0 %v543_v46 }
  0x54   :  { %545 = vmatprep.subr.bf16.mxu0 %v644_v39 }
  0x57   :  { %547 = vmatpush3.bf16.msra.mxu0 %v546_v49 }
  0x58   :  { %548 = vmatprep.subr.bf16.mxu0 %v644_v39 }
  0x5b   :  { %550 = vmatpush3.bf16.msra.mxu0 %v549_v52 }
  0x5c   :  { %551 = vmatprep.subr.bf16.mxu0 %v644_v39 }
  0x5f   :  { %553 = vmatpush3.bf16.msra.mxu0 %v552_v55 }
  0x60   :  { %554 = vmatprep.subr.bf16.mxu0 %v644_v39 }
  0x63   :  { %556 = vmatpush3.bf16.msra.mxu0 %v555_v58 }
  0x64   :  { %557 = vmatprep.subr.bf16.mxu0 %v644_v39 }
  0x67   :  { %559 = vmatpush3.bf16.msra.mxu0 %v558_v61 }
  0x6a   :  { %470 = vmatmul.mubr.f32.vlgmr.msra.gmra.mrb[2].mxu0 %v42_v62 }
 0x11d   :  { %v382_v63 = vpop.f32.mrb[0].mxu0 }
 0x11e   :  { %v417_v0 = vpop.f32.mrb[0].mxu1  ;;  %v383_v1 = vpop.f32.mrb[1].mxu0 }
 0x11f   :  { %v384_v2 = vadd.f32 %v383_v1, %v382_v63  ;;  %v418_v3 = vpop.f32.mrb[1].mxu1 }
 0x120   :  { %v419_v4 = vadd.f32 %v418_v3, %v417_v0 }
 0x122   :  { %v260_v5 = vadd.f32 %v419_v4, %v384_v2 }
 0x13d   :  { %v329_v6 = vpop.f32.mrb[2].mxu0 }
 0x13e   :  { %v330_v7 = vadd.f32 %v329_v6, %v260_v5  ;;  %v471_v8 = vpop.f32.mrb[3].mxu0 }
 0x140   :  { %333 = vst [vmem:[#allocation7] sm:$0xff] %v330_v7 }
 0x141   :  { %623 = shalt.err (!%p620_p6)
}
 0x142   :  { %s624_s10 = scalar_lea.hbm %s708_s2, 128 }
 0x143   :  { %p625_p7 = scmp.ne.s32.totalorder %s708_s2, %s624_s10  ;;  %p628_p8 = scmp.lt.u32.totalorder %s624_s10, %s708_s2 }
 0x145   :  { %p630_p9 = pnand %p628_p8, %p625_p7 }
 0x147   :  { %633 = shalt.err (!%p630_p9)
}
 0x148   :  { %343 = dma.vmem_to_hbm [thread:$0]  %s341_s6, 128, %s708_s2, [#allocation4]  }
 0x149   :  { %638 = dma.done.wait [#allocation4], 128  }
 0x14a   :  { %639 = vsyncadd [#allocation4], 4294967168 }
 0x14b   :  { %347 = vsyncpa [#allocation3], 1 }
 0x14c   :  { %348 = vsyncpa [#allocation6], 1 }
 0x14d   :  { %349 = vsyncpa [#allocation4], 1 }

</bundles_post_ra>
